<compile_context>
chip_gen: v5e
topology: v5e:2x2
jax: 0.10.0
libtpu: 0.0.40
codegen_flags: <defaults>
</compile_context>

<pallas_src>
import functools
import math

import jax
import jax.numpy as jnp
from jax.experimental import pallas as pl
from jax.experimental.pallas import tpu as pltpu


# ---------------------------------------------------------------------------
# Kernel body
# ---------------------------------------------------------------------------
def _noise_switch_kernel(x_ref, noise_ref, sig_ref, o_ref, *, coeff, inv_bsm1):
    """out = x + noise * sigmas * std(x, axis=0, ddof=1) * coeff.

    x_ref/noise_ref/o_ref: (B, tf) tiles in the native I/O dtype,
    sig_ref: (1, tf) f32 tile.  All math is done in f32.
    """
    x = x_ref[...].astype(jnp.float32)
    mean = jnp.mean(x, axis=0, keepdims=True)
    d = x - mean
    var = jnp.sum(d * d, axis=0, keepdims=True) * inv_bsm1     # unbiased (ddof=1)
    scaler = sig_ref[...] * jnp.sqrt(var) * coeff              # (1, tf) broadcast
    noise = noise_ref[...].astype(jnp.float32)
    o_ref[...] = (x + noise * scaler).astype(o_ref.dtype)


# ---------------------------------------------------------------------------
# Wrapper helpers
# ---------------------------------------------------------------------------
def _apply_force_proba(sf, force_proba):
    """Cheap parameter glue -> plain JAX (matches the torch clamp/full logic)."""
    if force_proba is None:
        return sf
    if isinstance(force_proba, tuple):
        assert len(force_proba) == 2, force_proba
        return jnp.clip(sf, 1.0 - force_proba[1], 1.0 - force_proba[0])
    if isinstance(force_proba, (int, float)):
        return jnp.full_like(sf, 1.0 - float(force_proba))
    raise ValueError(f"force_proba must be a float or a 2-tuple, got {force_proba}")


def _vmem_limit_bytes():
    """Per-generation scoped-VMEM limit: 3/4 of physical, capped at 96 MiB.
    v5e/v6e (128 MiB) -> 96 MiB; v7x (64 MiB/TC) -> 48 MiB."""
    try:
        cap = int(pltpu.get_tpu_info().vmem_capacity_bytes)
    except Exception:
        cap = 64 * 2**20  # conservative: v7x per-TensorCore VMEM
    return int(min(96 * 2**20, (cap * 3) // 4))


def _pick_tf(B, F, itemsize, n_hbm_streams, vmem_budget_bytes):
    """Largest multiple-of-128 divisor of F whose (B, tf) working set fits the
    VMEM budget; prefer >= 2 grid steps (keeps both v7x TensorCores busy)
    unless that would shrink the tile drastically."""
    n128 = F // 128
    # Bytes of VMEM per lane column: double-buffered native-dtype HBM streams
    # + ~3 f32 temporaries for the in-kernel upcast math + sigmas tile.
    per_lane = 2 * n_hbm_streams * B * itemsize + 3 * B * 4 + 2 * 4
    d_cap = max(1, vmem_budget_bytes // (128 * per_lane))
    divs = [d for d in range(1, n128 + 1) if n128 % d == 0 and d <= d_cap]
    d_all = max(divs)
    multi = [d for d in divs if n128 // d >= 2]
    if multi and max(multi) * 4 >= d_all:
        return max(multi) * 128
    return d_all * 128


# ---------------------------------------------------------------------------
# Forward
# ---------------------------------------------------------------------------
def noise_switch_forward(x, sigmas, noise=None, *, noise_add_coeff=0.5,
                         force_proba=None, seed=0, tf=None, force_pallas=False):
    """NoiseSwitch.forward (return_mask=False, return_x_and_mask=False).

    If `noise` is None, Gaussian noise is drawn with jax.random.PRNGKey(seed)
    in the wrapper and streamed into the kernel.
    """
    B = x.shape[0]
    shape = x.shape[1:]
    assert sigmas.shape == shape, (sigmas.shape, shape)
    assert B >= 2, "unbiased std over the batch (ddof=1) requires batch >= 2"
    F = int(math.prod(shape))
    assert F % 128 == 0, "flattened feature dim must be a multiple of 128 (lane axis)"

    itemsize = jnp.dtype(x.dtype).itemsize
    xf = x.reshape(B, F)                              # native dtype, no wrapper upcast
    sf = _apply_force_proba(sigmas.reshape(1, F).astype(jnp.float32), force_proba)

    if noise is None:
        noise = jax.random.normal(jax.random.PRNGKey(seed), (B, F), dtype=jnp.float32)
    nf = noise.reshape(B, F).astype(x.dtype)          # stream in native dtype

    # Tiny problems: pallas_call / DMA setup cost dwarfs the work; let XLA fuse it.
    n_streams = 3                                     # x, noise, out
    if not force_pallas and (n_streams * B * F * itemsize) < (1 << 20):
        x32 = xf.astype(jnp.float32)
        n32 = nf.astype(jnp.float32)
        std = jnp.std(x32, axis=0, keepdims=True, ddof=1)
        return (x32 + n32 * sf * std * noise_add_coeff).astype(x.dtype).reshape(x.shape)

    vmem_limit = _vmem_limit_bytes()
    if tf is None:
        tf = _pick_tf(B, F, itemsize, n_streams, vmem_limit // 2)
    assert F % tf == 0 and tf % 128 == 0, (F, tf)
    grid = (F // tf,)

    out = pl.pallas_call(
        functools.partial(_noise_switch_kernel,
                          coeff=float(noise_add_coeff),
                          inv_bsm1=1.0 / float(B - 1)),
        out_shape=jax.ShapeDtypeStruct((B, F), x.dtype),
        grid_spec=pltpu.PrefetchScalarGridSpec(
            num_scalar_prefetch=0,
            grid=grid,
            in_specs=[
                pl.BlockSpec((B, tf), lambda i: (0, i)),   # x
                pl.BlockSpec((B, tf), lambda i: (0, i)),   # noise
                pl.BlockSpec((1, tf), lambda i: (0, i)),   # sigmas (f32)
            ],
            out_specs=pl.BlockSpec((B, tf), lambda i: (0, i)),
        ),
        compiler_params=pltpu.CompilerParams(
            dimension_semantics=("parallel",),
            vmem_limit_bytes=vmem_limit),
    )(xf, nf, sf)
    return out.reshape(x.shape)


# ---------------------------------------------------------------------------
# Demo / correctness checks
# ---------------------------------------------------------------------------
if __name__ == "__main__":
    key = jax.random.PRNGKey(0)
    kx, kn = jax.random.split(key)

    bs = 2
    shape = (4, 16, 16)               # NCHW-ish conv activation, F = 1024
    s_init = 1.0
    noise_add_coeff = 0.5

    x = jax.random.normal(kx, (bs,) + shape, dtype=jnp.float32)
    noise = jax.random.normal(kn, (bs,) + shape, dtype=jnp.float32)
    sigmas = jnp.full(shape, s_init, dtype=jnp.float32)

    x_std = jnp.std(x, axis=0, keepdims=True, ddof=1)

    # 1) External-noise path: bit-comparable against the pure-JAX reference.
    out = noise_switch_forward(x, sigmas, noise,
                               noise_add_coeff=noise_add_coeff, force_pallas=True)
    out = jax.block_until_ready(out)
    ref = x + noise * sigmas[None] * x_std * noise_add_coeff
    assert out.shape == x.shape and out.dtype == x.dtype
    assert jnp.allclose(out, ref, atol=1e-5, rtol=1e-5), "mismatch vs reference"

    # 2) force_proba tuple clamp path.
    out_fp = noise_switch_forward(x, sigmas, noise,
                                  noise_add_coeff=noise_add_coeff,
                                  force_proba=(0.25, 0.75), force_pallas=True)
    out_fp = jax.block_until_ready(out_fp)
    sig_fp = jnp.clip(sigmas, 1.0 - 0.75, 1.0 - 0.25)
    ref_fp = x + noise * sig_fp[None] * x_std * noise_add_coeff
    assert jnp.allclose(out_fp, ref_fp, atol=1e-5, rtol=1e-5), "force_proba mismatch"

    # 3) bf16 I/O path (native-dtype HBM streams, f32 math in-kernel).
    xb = x.astype(jnp.bfloat16)
    nb = noise.astype(jnp.bfloat16)
    out_b = noise_switch_forward(xb, sigmas, nb,
                                 noise_add_coeff=noise_add_coeff, force_pallas=True)
    out_b = jax.block_until_ready(out_b)
    xb32 = xb.astype(jnp.float32)
    nb32 = nb.astype(jnp.float32)
    ref_b = (xb32 + nb32 * sigmas[None]
             * jnp.std(xb32, axis=0, keepdims=True, ddof=1)
             * noise_add_coeff).astype(jnp.bfloat16)
    assert out_b.dtype == jnp.bfloat16
    assert jnp.allclose(out_b.astype(jnp.float32), ref_b.astype(jnp.float32),
                        atol=5e-2, rtol=5e-2), "bf16 path mismatch"

    # 4) noise=None path: noise drawn in the wrapper from PRNGKey(seed) and
    #    streamed through the same kernel -> exactly reproducible.
    seed = 1234
    out_rng = noise_switch_forward(x, sigmas, noise=None, seed=seed,
                                   noise_add_coeff=noise_add_coeff,
                                   force_pallas=True)
    out_rng = jax.block_until_ready(out_rng)
    n_ref = jax.random.normal(jax.random.PRNGKey(seed),
                              (bs, int(math.prod(shape))),
                              dtype=jnp.float32).reshape(x.shape)
    ref_rng = x + n_ref * sigmas[None] * x_std * noise_add_coeff
    assert jnp.all(jnp.isfinite(out_rng)), "non-finite output from noise=None path"
    assert jnp.allclose(out_rng, ref_rng, atol=1e-5, rtol=1e-5), "noise=None mismatch"

    print("KERNEL_OK")
</pallas_src>

<mosaic_0001>
module attributes {stable_mosaic.version = 11 : i64} {
  func.func @_noise_switch_kernel(%arg0: i32, %arg1: memref<2x512xf32, #tpu.memory_space<vmem>>, %arg2: memref<2x512xf32, #tpu.memory_space<vmem>>, %arg3: memref<1x512xf32, #tpu.memory_space<vmem>>, %arg4: memref<2x512xf32, #tpu.memory_space<vmem>>) attributes {dimension_semantics = [#tpu.dimension_semantics<parallel>], iteration_bounds = array<i64: 2>, scalar_prefetch = 0 : i64, scratch_operands = 0 : i64, tpu.core_type = #tpu.core_type<tc>, window_params = [{transform_indices = @transform_0, window_bounds = array<i64: 2, 512>}, {transform_indices = @transform_1, window_bounds = array<i64: 2, 512>}, {transform_indices = @transform_2, window_bounds = array<i64: 1, 512>}, {transform_indices = @transform_3, window_bounds = array<i64: 2, 512>}]} {
    %c0 = arith.constant 0 : index
    %c0_0 = arith.constant 0 : index
    %0 = vector.load %arg1[%c0, %c0_0] : memref<2x512xf32, #tpu.memory_space<vmem>>, vector<2x512xf32>
    %cst = arith.constant dense<0.000000e+00> : vector<512xf32>
    %1 = vector.multi_reduction <add>, %0, %cst [0] : vector<2x512xf32> to vector<512xf32>
    %2 = vector.shape_cast %1 : vector<512xf32> to vector<1x512xf32>
    %cst_1 = arith.constant 2.000000e+00 : f32
    %3 = vector.broadcast %cst_1 : f32 to vector<1x512xf32>
    %4 = arith.divf %2, %3 : vector<1x512xf32>
    %5 = vector.broadcast %4 : vector<1x512xf32> to vector<2x512xf32>
    %6 = arith.subf %0, %5 : vector<2x512xf32>
    %7 = arith.mulf %6, %6 : vector<2x512xf32>
    %cst_2 = arith.constant dense<0.000000e+00> : vector<512xf32>
    %8 = vector.multi_reduction <add>, %7, %cst_2 [0] : vector<2x512xf32> to vector<512xf32>
    %9 = vector.shape_cast %8 : vector<512xf32> to vector<1x512xf32>
    %cst_3 = arith.constant 1.000000e+00 : f32
    %10 = vector.broadcast %cst_3 : f32 to vector<1x512xf32>
    %11 = arith.mulf %9, %10 : vector<1x512xf32>
    %c0_4 = arith.constant 0 : index
    %c0_5 = arith.constant 0 : index
    %12 = vector.load %arg3[%c0_4, %c0_5] : memref<1x512xf32, #tpu.memory_space<vmem>>, vector<1x512xf32>
    %13 = math.sqrt %11 : vector<1x512xf32>
    %14 = arith.mulf %12, %13 : vector<1x512xf32>
    %cst_6 = arith.constant 5.000000e-01 : f32
    %15 = vector.broadcast %cst_6 : f32 to vector<1x512xf32>
    %16 = arith.mulf %14, %15 : vector<1x512xf32>
    %c0_7 = arith.constant 0 : index
    %c0_8 = arith.constant 0 : index
    %17 = vector.load %arg2[%c0_7, %c0_8] : memref<2x512xf32, #tpu.memory_space<vmem>>, vector<2x512xf32>
    %18 = vector.broadcast %16 : vector<1x512xf32> to vector<2x512xf32>
    %19 = arith.mulf %17, %18 : vector<2x512xf32>
    %20 = arith.addf %0, %19 : vector<2x512xf32>
    %c0_9 = arith.constant 0 : index
    %c0_10 = arith.constant 0 : index
    %21 = vector.load %arg4[%c0_9, %c0_10] : memref<2x512xf32, #tpu.memory_space<vmem>>, vector<2x512xf32>
    tpu.vector_store %arg4[%c0_9, %c0_10], %20 {strides = array<i32>} : memref<2x512xf32, #tpu.memory_space<vmem>>, vector<2x512xf32>,
    return
  }
  func.func @transform_0(%arg0: i32) -> (i32, i32) {
    %c0_i32 = arith.constant 0 : i32
    %c0_i32_0 = arith.constant 0 : i32
    return %c0_i32, %arg0 : i32, i32
  }
  func.func @transform_1(%arg0: i32) -> (i32, i32) {
    %c0_i32 = arith.constant 0 : i32
    %c0_i32_0 = arith.constant 0 : i32
    return %c0_i32, %arg0 : i32, i32
  }
  func.func @transform_2(%arg0: i32) -> (i32, i32) {
    %c0_i32 = arith.constant 0 : i32
    %c0_i32_0 = arith.constant 0 : i32
    return %c0_i32, %arg0 : i32, i32
  }
  func.func @transform_3(%arg0: i32) -> (i32, i32) {
    %c0_i32 = arith.constant 0 : i32
    %c0_i32_0 = arith.constant 0 : i32
    return %c0_i32, %arg0 : i32, i32
  }
}

</mosaic_0001>

<bundles_post_ra>
// kernel: tpu_custom_call.1
= control target key start
LH: loop header
LB: loop body
LE: loop exit
PB: predicated region body
PF: predicated region fallthrough
CT: control target
= control target key end

     0   :  { %s1064_s0 = inlined_call_operand.hbm [shape: f32[2,1024], index: 0, kind: input, shape index: {}]   ;;  %s1065_s1 = inlined_call_operand.hbm [shape: f32[2,1024], index: 1, kind: input, shape index: {}]   ;;  %s1066_s2 = inlined_call_operand.hbm [shape: f32[1,1024], index: 2, kind: input, shape index: {}]   ;;  %s1067_s3 = inlined_call_operand.hbm [shape: f32[2,1024], index: 3, kind: output, shape index: {}]  }
   0x1   :  { %1068 = sst [smem:[#allocation13_spill]] %s1065_s1 }
   0x2   :  { %8 = vsyncpa [#allocation3], 0 }
   0x3   :  { %10 = vsyncpa [#allocation3 + $0x1], 0 }
   0x4   :  { %11 = vsyncpa [#allocation6], 0 }
   0x5   :  { %13 = vsyncpa [#allocation6 + $0x1], 0 }
   0x6   :  { %14 = vsyncpa [#allocation4], 0 }
   0x7   :  { %16 = vsyncpa [#allocation4 + $0x1], 0  ;;  %s857_s12 = smov 0   ;;  %s859_s13 = smov 0  }
   0x8   :  { %s861_s14 = smov 0   ;;  %s863_s15 = smov 0  }
   0x9 LB: > { %s878_s16 = sadd.s32 4294967295, %s834_s15   ;;  %s583_s17 = sadd.s32 4294967294, %s834_s15   ;;  %s834_s15 = sphi %s863_s15, %s1080_s15   ;;  %s830_s14 = sphi %s861_s14, %s1079_s14   ;;  %s826_s13 = sphi %s859_s13, %s1078_s13   ;;  %s822_s12 = sphi %s857_s12, %s1077_s12  }
   0xa   : > { %s882_s18 = sadd.s32 1, %s834_s15   ;;  %s29_s19 = sadd.s32 1, %s830_s14 }
   0xb   : > { %s26_s20 = ssub.s32 %s834_s15, %s882_s18  ;;  %p36_p0 = scmp.ne.s32.totalorder %s830_s14, %s826_s13 }
   0xc   : > { %p27_p1 = scmp.eq.s32.totalorder %s26_s20, 0  ;;  %p37_p2 = scmp.eq.s32.totalorder %s834_s15, 0 }
   0xd   : > { %p42_p3 = scmp.ne.s32.totalorder %s826_s13, %s822_s12  ;;  %p43_p4 = scmp.eq.s32.totalorder %s878_s16, 0 }
   0xe   : > { %s894_s21 = scalar_select %p27_p1, %s830_s14, %s29_s19  }
   0xf   : > { %p38_p5 = por %p37_p2, %p36_p0  ;;  %p896_p6 = por %p43_p4, %p42_p3 }
  0x10   : > { %1069 = sst [smem:[#allocation12_spill]] %s894_s21  ;;  %p118_p7 = scmp.eq.s32.totalorder %s878_s16, 1 }
  0x11   : > { %p124_p8 = scmp.eq.s32.totalorder %s583_s17, 1  ;;  %p585_p9 = scmp.ge.s32.totalorder %s834_s15, 2 }
  0x12   : > { %p629_p10 = scmp.lt.s32.totalorder %s834_s15, 2  ;;  %p903_p11 = por %p118_p7, %p36_p0 }
  0x13   : > { %p907_p12 = por %p124_p8, %p42_p3  ;;  %s912_s25 = sand.u32 1, %s830_s14  }
  0x14   : > { %s604_s26 = sshll.u32 %s834_s15, 3  ;;  %s586_s27 = sshll.u32 %s912_s25, 3 }
  0x15   : > { %p916_p13 = pnand %p629_p10, %p38_p5  ;;  %s164_s29 = sand.u32 1, %s834_s15  }
  0x16   : > { %s1074_s1 = sld [smem:[#allocation13_spill]]  ;;  %s168_s6 = scalar_lea.vmem [#allocation5], %s586_s27 }
  0x17   : > { %s177_s7 = sshll.u32 %s168_s6, 4  ;;  %p594_p0 = scmp.ge.s32.totalorder %s834_s15, 1  ;;  %s178_s7 = int_to_ptr.vmem [resolvable:$true] %s177_s7 }
  0x18   : > { %s927_s9 = scalar_lea.sflag [#allocation6], %s164_s29  ;;  %p678_p2 = pneg %p916_p13 }
  0x1c   : > { %s173_s5 = scalar_lea.hbm %s1074_s1, %s604_s26  ;;  %s681_s20 = scalar_lea.hbm %s1074_s1, 16 }
  0x1d   : > { %s175_s8 = sshll.u32 %s173_s5, 4  ;;  %s176_s8 = int_to_ptr.hbm [resolvable:$true] %s175_s8 }
  0x1e   : > { %s674_s10 = sshra.s32 %s176_s8, 4  ;;  %s675_s10 = int_to_ptr.hbm [resolvable:$true] %s674_s10 }
  0x1f   : > { %s676_s11 = scalar_lea.hbm %s675_s10, 8  ;;  %p682_p5 = scmp.lt.s32.totalorder %s675_s10, %s1074_s1 }
  0x20   : > { %p677_p1 = scmp.ne.s32.totalorder %s675_s10, %s676_s11  ;;  %p683_p7 = scmp.lt.s32.totalorder %s681_s20, %s676_s11 }
  0x22   : > { %p679_p3 = pnand %p678_p2, %p677_p1  ;;  %p684_p8 = por %p683_p7, %p682_p5 }
  0x24   : > { %p680_p4 = pneg %p679_p3 }
  0x26   : > { %p685_p10 = pnand %p684_p8, %p680_p4 }
  0x28   : > { %688 = shalt.err (!%p685_p10)
}
  0x29   : > { %621 = dma.hbm_to_vmem [thread:$0]  (!%p916_p13), %s176_s8, 128, %s178_s7, %s927_s9  }
  0x2a   : > { %p201_p1 = scmp.lt.s32.totalorder %s834_s15, 3  ;;  %s153_s6 = scalar_lea.hbm %s1064_s0, %s604_s26 }
  0x2b   : > { %s155_s11 = sshll.u32 %s153_s6, 4  ;;  %s148_s17 = scalar_lea.vmem [#allocation2], %s586_s27  ;;  %s156_s11 = int_to_ptr.hbm [resolvable:$true] %s155_s11 }
  0x2c   : > { %p949_p3 = pnand %p594_p0, %p201_p1  ;;  %s157_s19 = sshll.u32 %s148_s17, 4  ;;  %s158_s19 = int_to_ptr.vmem [resolvable:$true] %s157_s19 }
  0x2d   : > { %s592_s20 = sshll.u32 %s912_s25, 2  ;;  %s145_s30 = scalar_lea.sflag [#allocation3], %s912_s25 }
  0x2e   : > { %s704_s4 = sshra.s32 %s156_s11, 4  ;;  %s711_s29 = scalar_lea.hbm %s1064_s0, 16  ;;  %s705_s4 = int_to_ptr.hbm [resolvable:$true] %s704_s4 }
  0x2f   : > { %s706_s7 = scalar_lea.hbm %s705_s4, 8  ;;  %p712_p0 = scmp.lt.s32.totalorder %s705_s4, %s1064_s0 }
  0x30   : > { %p707_p4 = scmp.ne.s32.totalorder %s705_s4, %s706_s7  ;;  %p713_p8 = scmp.lt.s32.totalorder %s711_s29, %s706_s7 }
  0x32   : > { %p709_p5 = pnand %p707_p4, %p678_p2  ;;  %p714_p10 = por %p713_p8, %p712_p0 }
  0x34   : > { %p710_p7 = pneg %p709_p5 }
  0x36   : > { %p715_p1 = pnand %p714_p10, %p710_p7 }
  0x38   : > { %718 = shalt.err (!%p715_p1)
}
  0x39   : > { %618 = dma.hbm_to_vmem [thread:$0]  (!%p916_p13), %s156_s11, 128, %s158_s19, %s145_s30  }
  0x3a   : > { %s593_s25 = sshll.u32 %s834_s15, 2  ;;  %s188_s26 = scalar_lea.vmem [#allocation7], %s592_s20 }
  0x3b   : > { %s192_s1 = scalar_lea.hbm %s1066_s2, %s593_s25  ;;  %s196_s8 = sshll.u32 %s188_s26, 4  ;;  %s197_s8 = int_to_ptr.vmem [resolvable:$true] %s196_s8 }
  0x3c   : > { %s194_s21 = sshll.u32 %s192_s1, 4  ;;  %s741_s19 = scalar_lea.hbm %s1066_s2, 8  ;;  %s195_s21 = int_to_ptr.hbm [resolvable:$true] %s194_s21 }
  0x3d   : > { %s734_s4 = sshra.s32 %s195_s21, 4  ;;  %s735_s4 = int_to_ptr.hbm [resolvable:$true] %s734_s4 }
  0x3e   : > { %s736_s7 = scalar_lea.hbm %s735_s4, 4  ;;  %p742_p0 = scmp.lt.s32.totalorder %s735_s4, %s1066_s2 }
  0x3f   : > { %p737_p4 = scmp.ne.s32.totalorder %s735_s4, %s736_s7  ;;  %p743_p8 = scmp.lt.s32.totalorder %s741_s19, %s736_s7 }
  0x41   : > { %p739_p5 = pnand %p737_p4, %p678_p2  ;;  %p744_p10 = por %p743_p8, %p742_p0 }
  0x43   : > { %p740_p7 = pneg %p739_p5 }
  0x45   : > { %p745_p1 = pnand %p744_p10, %p740_p7 }
  0x47   : > { %748 = shalt.err (!%p745_p1)
}
  0x48   : > { %624 = dma.hbm_to_vmem [thread:$0]  (!%p916_p13), %s195_s21, 64, %s197_s8, %s927_s9  }
  0x49   : > { %205 = sbr.rel (%p949_p3) target bundleno = 183 (0xb7), region = 32  ;;  %s987_s1 = sand.u32 (!%p949_p3), 1, %s826_s13  }
  0x4a   : > { %s990_s20 = sshll.u32 (!%p949_p3), %s987_s1, 3  ;;  %s208_s6 = scalar_lea.sflag (!%p949_p3), [#allocation3], %s987_s1 }
  0x4b   : > { %s211_s25 = scalar_lea.vmem (!%p949_p3), [#allocation2], %s990_s20 }
  0x4e   : > { %809 = dma.done.wait (%p896_p6), %s208_s6, 128  }
  0x4f   : > { %811 = vsyncadd (%p896_p6), %s208_s6, 4294967168  ;;  %s217_s21 = sand.u32 1, %s878_s16   ;;  %s221_s9 = scalar_lea.vmem [#allocation5], %s990_s20 }
  0x50   : > { %s218_s28 = scalar_lea.sflag [#allocation6], %s217_s21 }
  0x51   : > { %813 = dma.done.wait (%p896_p6), %s218_s28, 192  }
  0x52   : > { %815 = vsyncadd (%p896_p6), %s218_s28, 4294967104  ;;  %v836_v0 = vmov 2.0   ;;  %v1004_v2 = vld [vmem:[%s211_s25] sm:$0xff]  ;;  %vm280_vm0 = vcmask 1041408   ;;  %vm328_vm2 = vcmask 1045508   ;;  %vm330_vm3 = vcmask 1043456  }
  0x53   : > { %664 = vrcp.f32 %v836_v0  ;;  %271 = vst [vmem:[#allocation1] ss:$4 sm:$0xff] %v1004_v2  ;;  %vm429_vm5 = vcmask 1040384   ;;  %s597_s22 = sshll.u32 %s987_s1, 2  ;;  %vm431_vm13 = vcmask 1042434   ;;  %s606_s27 = sshll.u32 %s878_s16, 3 }
  0x54   : > { %s231_s10 = scalar_lea.vmem [#allocation7], %s597_s22  ;;  %s465_s8 = scalar_lea.hbm %s1067_s3, %s606_s27 }
  0x55   : > { %s264_s16 = scalar_lea.vmem [#allocation8], %s990_s20  ;;  %s469_s7 = sshll.u32 %s465_s8, 4  ;;  %s470_s7 = int_to_ptr.hbm [resolvable:$true] %s469_s7 }
  0x56   : > { %s467_s4 = sshll.u32 %s264_s16, 4  ;;  %s454_s29 = scalar_lea.sflag [#allocation4], %s987_s1  ;;  %s468_s4 = int_to_ptr.vmem [resolvable:$true] %s467_s4 }
  0x57   : > { %s778_s11 = sshra.s32 %s470_s7, 4  ;;  %s784_s20 = scalar_lea.hbm %s1067_s3, 16  ;;  %s779_s11 = int_to_ptr.hbm [resolvable:$true] %s778_s11 }
  0x58   : > { %s780_s19 = scalar_lea.hbm %s779_s11, 8  ;;  %p785_p3 = scmp.lt.s32.totalorder %s779_s11, %s1067_s3 }
  0x59   : > { %v665_v1 = vpop.eup %664  ;;  %p781_p6 = scmp.ne.s32.totalorder %s779_s11, %s780_s19  ;;  %p786_p4 = scmp.lt.s32.totalorder %s784_s20, %s780_s19 }
  0x5a   : > { %v310_v3 = vmul.f32 2.0, %v665_v1  ;;  %v272_v5 = vld.sshfl [vmem:[#allocation1] sm:$0xff pattern:$0x73625140]  ;;  %vm314_vm1 = vweird.f32 %v665_v1 }
  0x5b   : > { %v273_v6 = vld.sshfl [vmem:[#allocation1 + $0x8] sm:$0xff pattern:$0x73625140]  ;;  %v274_v7 = vld.sshfl [vmem:[#allocation1 + $0x10] sm:$0xff pattern:$0x73625140]  ;;  %p782_p13 = pnand %p781_p6, %p903_p11  ;;  %p787_p5 = por %p786_p4, %p785_p3 }
  0x5c   : > { %v311_v4 = vsub.f32 1.0, %v310_v3  ;;  %v275_v8 = vld.sshfl [vmem:[#allocation1 + $0x18] sm:$0xff pattern:$0x73625140]  ;;  %v281_v9 = vsel %vm280_vm0, %v272_v5, 0.0  ;;  %v288_v10 = vsel %vm280_vm0, %v273_v6, 0.0 }
  0x5d   : > { %v295_v11 = vsel %vm280_vm0, %v274_v7, 0.0  ;;  %v302_v12 = vsel %vm280_vm0, %v275_v8, 0.0  ;;  %v282_v13 = vrot.slane %v281_v9, 4  ;;  %v289_v14 = vrot.slane %v288_v10, 4  ;;  %p783_p2 = pneg %p782_p13 }
  0x5e   : > { %v296_v15 = vrot.slane %v295_v11, 4  ;;  %v303_v16 = vrot.slane %v302_v12, 4  ;;  %v312_v17 = vmul.f32 %v665_v1, %v311_v4 }
  0x5f   : > { %v283_v18 = vadd.f32 %v282_v13, %v281_v9  ;;  %v290_v19 = vadd.f32 %v289_v14, %v288_v10  ;;  %p788_p7 = pnand %p787_p5, %p783_p2 }
  0x60   : > { %v297_v20 = vadd.f32 %v296_v15, %v295_v11  ;;  %v304_v21 = vadd.f32 %v303_v16, %v302_v12  ;;  %v313_v26 = vadd.f32 %v665_v1, %v312_v17 }
  0x61   : > { %v284_v22 = vrot.slane %v283_v18, 2  ;;  %v291_v23 = vrot.slane %v290_v19, 2 }
  0x62   : > { %v298_v24 = vrot.slane %v297_v20, 2  ;;  %v305_v25 = vrot.slane %v304_v21, 2  ;;  %v315_v35 = vsel %vm314_vm1, %v665_v1, %v313_v26 }
  0x63   : > { %v285_v27 = vadd.f32 %v284_v22, %v283_v18  ;;  %v292_v28 = vadd.f32 %v291_v23, %v290_v19 }
  0x64   : > { %v299_v29 = vadd.f32 %v298_v24, %v297_v20  ;;  %v306_v30 = vadd.f32 %v305_v25, %v304_v21 }
  0x65   : > { %v286_v31 = vrot.slane %v285_v27, 1  ;;  %v293_v32 = vrot.slane %v292_v28, 1 }
  0x66   : > { %v300_v33 = vrot.slane %v299_v29, 1  ;;  %v307_v34 = vrot.slane %v306_v30, 1 }
  0x67   : > { %v287_v36 = vadd.f32 %v286_v31, %v285_v27  ;;  %v294_v37 = vadd.f32 %v293_v32, %v292_v28 }
  0x68   : > { %v301_v38 = vadd.f32 %v300_v33, %v299_v29  ;;  %v308_v39 = vadd.f32 %v307_v34, %v306_v30 }
  0x69   : > { %v317_v40 = vmul.f32 %v315_v35, %v294_v37  ;;  %v316_v43 = vmul.f32 %v315_v35, %v287_v36 }
  0x6a   : > { %v318_v41 = vmul.f32 %v315_v35, %v301_v38  ;;  %v319_v42 = vmul.f32 %v315_v35, %v308_v39 }
  0x6b   : > { %v324_v44 = vrot.slane %v317_v40, 6 }
  0x6c   : > { %v325_v45 = vrot.slane %v318_v41, 4  ;;  %v326_v46 = vrot.slane %v319_v42, 2 }
  0x6d   : > { %v327_v47 = vsel %vm280_vm0, %v316_v43, %v324_v44 }
  0x6e   : > { %v329_v48 = vsel %vm328_vm2, %v325_v45, %v326_v46 }
  0x6f   : > { %v331_v49 = vsel %vm330_vm3, %v327_v47, %v329_v48 }
  0x70   : > { %v333_v50 = vsub.f32 %v1004_v2, %v331_v49 }
  0x72   : > { %v334_v51 = vmul.f32 %v333_v50, %v333_v50 }
  0x74   : > { %336 = vst [vmem:[#allocation1] ss:$4 sm:$0xff] %v334_v51 }
  0x7b   : > { %v337_v52 = vld.sshfl [vmem:[#allocation1] sm:$0xff pattern:$0x73625140]  ;;  %v338_v53 = vld.sshfl [vmem:[#allocation1 + $0x8] sm:$0xff pattern:$0x73625140] }
  0x7c   : > { %v339_v54 = vld.sshfl [vmem:[#allocation1 + $0x10] sm:$0xff pattern:$0x73625140]  ;;  %v340_v55 = vld.sshfl [vmem:[#allocation1 + $0x18] sm:$0xff pattern:$0x73625140] }
  0x7d   : > { %v345_v56 = vsel %vm280_vm0, %v337_v52, 0.0  ;;  %v352_v57 = vsel %vm280_vm0, %v338_v53, 0.0  ;;  %v359_v58 = vsel %vm280_vm0, %v339_v54, 0.0  ;;  %v366_v59 = vsel %vm280_vm0, %v340_v55, 0.0 }
  0x7e   : > { %v346_v60 = vrot.slane %v345_v56, 4  ;;  %v353_v61 = vrot.slane %v352_v57, 4  ;;  %v360_v62 = vrot.slane %v359_v58, 4  ;;  %v367_v63 = vrot.slane %v366_v59, 4 }
  0x80   : > { %v347_v0 = vadd.f32 %v346_v60, %v345_v56  ;;  %v354_v1 = vadd.f32 %v353_v61, %v352_v57  ;;  %v361_v3 = vadd.f32 %v360_v62, %v359_v58  ;;  %v368_v4 = vadd.f32 %v367_v63, %v366_v59 }
  0x82   : > { %v348_v5 = vrot.slane %v347_v0, 2  ;;  %v355_v6 = vrot.slane %v354_v1, 2  ;;  %v362_v7 = vrot.slane %v361_v3, 2  ;;  %v369_v8 = vrot.slane %v368_v4, 2 }
  0x84   : > { %v349_v9 = vadd.f32 %v348_v5, %v347_v0  ;;  %v356_v10 = vadd.f32 %v355_v6, %v354_v1  ;;  %v363_v11 = vadd.f32 %v362_v7, %v361_v3  ;;  %v370_v12 = vadd.f32 %v369_v8, %v368_v4  ;;  %v373_v1 = vld [vmem:[%s231_s10] sm:$0xf] }
  0x86   : > { %v350_v13 = vrot.slane %v349_v9, 1  ;;  %v357_v14 = vrot.slane %v356_v10, 1  ;;  %v364_v15 = vrot.slane %v363_v11, 1  ;;  %v371_v16 = vrot.slane %v370_v12, 1 }
  0x88   : > { %v351_v17 = vadd.f32 %v350_v13, %v349_v9  ;;  %v358_v18 = vadd.f32 %v357_v14, %v356_v10  ;;  %v365_v19 = vadd.f32 %v364_v15, %v363_v11  ;;  %v372_v20 = vadd.f32 %v371_v16, %v370_v12  ;;  %v437_v14 = vld [vmem:[%s221_s9] sm:$0xff] }
  0x8a   : > { %666 = vrsqrt.f32 %v351_v17  ;;  %vm381_vm4 = vcmp.eq.f32.partialorder %v351_v17, inf  ;;  %vm383_vm6 = vcmp.eq.f32.partialorder %v351_v17, 0.0  ;;  %v384_v44 = vand.u32 2147483648, %v351_v17 }
  0x8b   : > { %668 = vrsqrt.f32 %v358_v18  ;;  %vm393_vm7 = vcmp.eq.f32.partialorder %v358_v18, inf  ;;  %vm395_vm8 = vcmp.eq.f32.partialorder %v358_v18, 0.0  ;;  %v396_v48 = vand.u32 2147483648, %v358_v18 }
  0x8c   : > { %670 = vrsqrt.f32 %v365_v19  ;;  %vm405_vm9 = vcmp.eq.f32.partialorder %v365_v19, inf  ;;  %vm407_vm10 = vcmp.eq.f32.partialorder %v365_v19, 0.0  ;;  %v408_v52 = vand.u32 2147483648, %v365_v19 }
  0x8d   : > { %672 = vrsqrt.f32 %v372_v20  ;;  %vm417_vm11 = vcmp.eq.f32.partialorder %v372_v20, inf  ;;  %v420_v56 = vand.u32 2147483648, %v372_v20  ;;  %vm419_vm12 = vcmp.eq.f32.partialorder %v372_v20, 0.0 }
  0x90   : > { %v667_v21 = vpop.eup %666 }
  0x91   : > { %v669_v22 = vpop.eup %668  ;;  %v375_v23 = vmul.f32 %v667_v21, %v351_v17 }
  0x92   : > { %v671_v24 = vpop.eup %670  ;;  %v387_v25 = vmul.f32 %v669_v22, %v358_v18 }
  0x93   : > { %v673_v26 = vpop.eup %672  ;;  %v376_v27 = vmul.f32 %v667_v21, %v375_v23  ;;  %v399_v28 = vmul.f32 %v671_v24, %v365_v19 }
  0x94   : > { %v388_v29 = vmul.f32 %v669_v22, %v387_v25  ;;  %v411_v30 = vmul.f32 %v673_v26, %v372_v20 }
  0x95   : > { %v377_v31 = vmul.f32 0.5, %v376_v27  ;;  %v400_v32 = vmul.f32 %v671_v24, %v399_v28 }
  0x96   : > { %v389_v33 = vmul.f32 0.5, %v388_v29  ;;  %v412_v34 = vmul.f32 %v673_v26, %v411_v30 }
  0x97   : > { %v378_v35 = vsub.f32 1.5, %v377_v31  ;;  %v401_v36 = vmul.f32 0.5, %v400_v32 }
  0x98   : > { %v390_v37 = vsub.f32 1.5, %v389_v33  ;;  %v413_v38 = vmul.f32 0.5, %v412_v34 }
  0x99   : > { %v379_v39 = vmul.f32 %v667_v21, %v378_v35  ;;  %v402_v40 = vsub.f32 1.5, %v401_v36 }
  0x9a   : > { %v391_v41 = vmul.f32 %v669_v22, %v390_v37  ;;  %v414_v42 = vsub.f32 1.5, %v413_v38 }
  0x9b   : > { %v380_v43 = vmul.f32 %v379_v39, %v351_v17  ;;  %v403_v45 = vmul.f32 %v671_v24, %v402_v40 }
  0x9c   : > { %v392_v46 = vmul.f32 %v391_v41, %v358_v18  ;;  %v415_v47 = vmul.f32 %v673_v26, %v414_v42 }
  0x9d   : > { %v404_v49 = vmul.f32 %v403_v45, %v365_v19  ;;  %v382_v50 = vsel %vm381_vm4, %v351_v17, %v380_v43 }
  0x9e   : > { %v394_v51 = vsel %vm393_vm7, %v358_v18, %v392_v46  ;;  %v416_v53 = vmul.f32 %v415_v47, %v372_v20  ;;  %v385_v60 = vsel %vm383_vm6, %v384_v44, %v382_v50 }
  0x9f   : > { %v397_v54 = vsel %vm395_vm8, %v396_v48, %v394_v51  ;;  %v406_v55 = vsel %vm405_vm9, %v365_v19, %v404_v49 }
  0xa0   : > { %v409_v57 = vsel %vm407_vm10, %v408_v52, %v406_v55  ;;  %v418_v58 = vsel %vm417_vm11, %v372_v20, %v416_v53  ;;  %v426_v59 = vrot.slane %v397_v54, 7 }
  0xa1   : > { %v421_v61 = vsel %vm419_vm12, %v420_v56, %v418_v58  ;;  %v427_v62 = vrot.slane %v409_v57, 6 }
  0xa2   : > { %v428_v63 = vrot.slane %v421_v61, 5  ;;  %v430_v0 = vsel %vm429_vm5, %v385_v60, %v426_v59 }
  0xa4   : > { %v432_v3 = vsel %vm431_vm13, %v427_v62, %v428_v63 }
  0xa5   : > { %v433_v4 = vsel %vm280_vm0, %v430_v0, %v432_v3 }
  0xa6   : > { %v435_v5 = vmul.f32 %v433_v4, %v373_v1 }
  0xa8   : > { %v436_v6 = vmul.f32 0.5, %v435_v5 }
  0xaa   : > { %v440_v7 = vperm.slane %v436_v6, 1  ;;  %v441_v8 = vperm.slane %v436_v6, 2  ;;  %v442_v9 = vperm.slane %v436_v6, 3  ;;  %v439_v10 = vperm.slane %v436_v6, 0 }
  0xac   : > { %v443_v11 = vrot.slane %v440_v7, 6  ;;  %v444_v12 = vrot.slane %v441_v8, 4  ;;  %v445_v13 = vrot.slane %v442_v9, 2 }
  0xae   : > { %v446_v15 = vsel %vm280_vm0, %v439_v10, %v443_v11  ;;  %v447_v16 = vsel %vm328_vm2, %v444_v12, %v445_v13 }
  0xaf   : > { %v448_v17 = vsel %vm330_vm3, %v446_v15, %v447_v16 }
  0xb0   : > { %v450_v18 = vmul.f32 %v448_v17, %v437_v14 }
  0xb2   : > { %v451_v19 = vadd.f32 %v450_v18, %v1004_v2 }
  0xb4   : > { %452 = vst [vmem:[%s264_s16] sm:$0xff] %v451_v19 }
  0xb5   : > { %791 = shalt.err (!%p788_p7)
}
  0xb6   : > { %613 = dma.vmem_to_hbm [thread:$0]  (%p903_p11), %s468_s4, 128, %s470_s7, %s454_s29  }
  0xb7 PF: > { %s481_s1 = sand.u32 1, %s822_s12   ;;  %p626_p0 = pnand %p585_p9, %p907_p12 }
  0xb8   : > { %s482_s21 = scalar_lea.sflag [#allocation4], %s481_s1 }
  0xb9   : > { %p627_p8 = pneg %p626_p0 }
  0xbb   : > { %817 = dma.done.wait (%p627_p8), %s482_s21, 128  }
  0xbc   : > { %819 = vsyncadd (%p627_p8), %s482_s21, 4294967168  ;;  %s1076_s28 = sld [smem:[#allocation12_spill]]  ;;  %p19_p10 = scmp.ge.s32.totalorder %s882_s18, 4  }
  0xbd   : > { %s1077_s12 = smov %s826_s13  ;;  %s1078_s13 = smov %s830_s14 }
  0xbe   : > { %s1080_s15 = smov %s882_s18  ;;  %21 = sbr.rel (!%p19_p10) target bundleno = 9 (0x9), region = 101 }
  0xc2   : > { %s1079_s14 = smov %s1076_s28 }
  0xc3   :  { %488 = vsyncpa [#allocation3], 1 }
  0xc4   :  { %490 = vsyncpa [#allocation3 + $0x1], 1 }
  0xc5   :  { %491 = vsyncpa [#allocation6], 1 }
  0xc6   :  { %493 = vsyncpa [#allocation6 + $0x1], 1 }
  0xc7   :  { %494 = vsyncpa [#allocation4], 1 }
  0xc8   :  { %496 = vsyncpa [#allocation4 + $0x1], 1 }

</bundles_post_ra>
